<compile_context>
chip_gen: v5e
topology: v5e:2x2
jax: 0.10.0
libtpu: 0.0.40
codegen_flags: <defaults>
</compile_context>

<pallas_src>
import functools

import jax
import jax.numpy as jnp
from jax.experimental import pallas as pl
from jax.experimental.pallas import tpu as pltpu


def _satlu_kernel(x_ref, o_ref, *, lower, upper):
    # Python-scalar bounds are weakly typed immediates -> result keeps dtype.
    o_ref[...] = jnp.minimum(jnp.maximum(x_ref[...], lower), upper)


def _sublane_multiple(dtype):
    # Packed sublane tile: (8,128) f32, (16,128) bf16/f16, (32,128) int8/fp8.
    return max(8, 32 // jnp.dtype(dtype).itemsize)


def _coerce_bound(value, dtype):
    if jnp.issubdtype(dtype, jnp.integer):
        iv = int(value)
        info = jnp.iinfo(dtype)
        if iv < int(info.min) or iv > int(info.max):
            raise ValueError(
                f"SatLU bound {value} is not representable in {dtype}")
        return iv
    return float(value)


def _pick_block_params():
    """Per-generation (target_block_bytes, vmem_limit_bytes)."""
    try:
        cap = pltpu.get_tpu_info().vmem_capacity_bytes
    except Exception:  # pragma: no cover - info query unavailable
        cap = None
    if cap is not None and cap <= 64 * 1024 * 1024:
        # v7x: 2 in + 2 out double buffers * 8 MiB = 32 MiB <= 0.75 * 48 MiB.
        return 8 * 1024 * 1024, 48 * 1024 * 1024
    # v5e / v6e (128 MiB physical VMEM).
    return 4 * 1024 * 1024, 32 * 1024 * 1024


def satlu(x, lower=0.0, upper=255.0, *, max_width=8192):
    """Elementwise hardtanh(x, lower, upper) via a Pallas TPU kernel."""
    orig_shape = x.shape
    dtype = x.dtype
    itemsize = jnp.dtype(dtype).itemsize
    sub = _sublane_multiple(dtype)

    lo = _coerce_bound(lower, dtype)
    hi = _coerce_bound(upper, dtype)

    target_block_bytes, vmem_limit_bytes = _pick_block_params()

    flat = x.reshape(-1)
    n = flat.shape[0]

    # Split off the (< 128-element) tail so the main body needs no pad/slice
    # HBM passes; the tail is clamped with plain jnp (at most 127 elements).
    rem = n % 128
    n_main = n - rem
    tail_out = None
    if rem:
        tail_out = jnp.clip(flat[n_main:], lo, hi).astype(dtype)
    if n_main == 0:
        # Entire tensor smaller than one lane row; kernel launch not worth it.
        return tail_out.reshape(orig_shape)
    main = flat[:n_main]

    # Widest lane dimension (multiple of 128, <= max_width) dividing n_main.
    width = 128
    w = (min(max_width, n_main) // 128) * 128
    while w >= 128:
        if n_main % w == 0:
            width = w
            break
        w -= 128

    rows = n_main // width
    slab = main.reshape(rows, width)

    # Row block sized for ~target_block_bytes, rounded to the sublane tile.
    br = (target_block_bytes // (width * itemsize)) // sub * sub
    br = max(sub, br)
    if br >= rows:
        if rows >= 2 * sub:
            # Split into >= 2 blocks so the "parallel" axis can shard across
            # both TensorCores on v7x megacore.
            br = (pl.cdiv(rows, 2) + sub - 1) // sub * sub
        else:
            # Tiny input: a single block equal to the full row extent is
            # legal even when rows is not sublane-aligned.
            br = rows
    else:
        # v7x megacore: avoid a small odd block count (2-TC load imbalance).
        nblk = pl.cdiv(rows, br)
        if 1 < nblk <= 8 and nblk % 2 == 1:
            br2 = max(sub, (pl.cdiv(rows, nblk + 1) + sub - 1) // sub * sub)
            if pl.cdiv(rows, br2) % 2 == 0:
                br = br2

    grid = (pl.cdiv(rows, br),)

    kernel = functools.partial(_satlu_kernel, lower=lo, upper=hi)

    out = pl.pallas_call(
        kernel,
        out_shape=jax.ShapeDtypeStruct((rows, width), dtype),
        grid_spec=pltpu.PrefetchScalarGridSpec(
            num_scalar_prefetch=0,
            grid=grid,
            in_specs=[pl.BlockSpec((br, width), lambda i: (i, 0))],
            out_specs=pl.BlockSpec((br, width), lambda i: (i, 0)),
        ),
        compiler_params=pltpu.CompilerParams(
            dimension_semantics=("parallel",),
            vmem_limit_bytes=vmem_limit_bytes,
        ),
    )(slab)

    out_flat = out.reshape(-1)
    if tail_out is not None:
        out_flat = jnp.concatenate([out_flat, tail_out])
    return out_flat.reshape(orig_shape)


if __name__ == "__main__":
    key = jax.random.PRNGKey(0)
    # NCHW input (batch=2, channels=4, spatial=16); scale so values exceed
    # [0, 255] on both sides.
    x = jax.random.normal(key, (2, 4, 16, 16), dtype=jnp.float32) * 300.0

    y = satlu(x, lower=0.0, upper=255.0)
    y = jax.block_until_ready(y)

    # Reference check against plain-JAX clamp (NaN propagation matches
    # F.hardtanh: min(max(x, lo), hi)).
    y_ref = jnp.clip(x, 0.0, 255.0)
    assert y.shape == x.shape and y.dtype == x.dtype
    assert jnp.allclose(y, y_ref), "mismatch vs reference clamp"

    print("KERNEL_OK")
</pallas_src>

<mosaic_0001>
module attributes {stable_mosaic.version = 11 : i64} {
  func.func @_satlu_kernel(%arg0: i32, %arg1: memref<1x2048xf32, #tpu.memory_space<vmem>>, %arg2: memref<1x2048xf32, #tpu.memory_space<vmem>>) attributes {dimension_semantics = [#tpu.dimension_semantics<parallel>], iteration_bounds = array<i64: 1>, scalar_prefetch = 0 : i64, scratch_operands = 0 : i64, tpu.core_type = #tpu.core_type<tc>, window_params = [{transform_indices = @transform_0, window_bounds = array<i64: 1, 2048>}, {transform_indices = @transform_1, window_bounds = array<i64: 1, 2048>}]} {
    %c0 = arith.constant 0 : index
    %c0_0 = arith.constant 0 : index
    %0 = vector.load %arg1[%c0, %c0_0] : memref<1x2048xf32, #tpu.memory_space<vmem>>, vector<1x2048xf32>
    %cst = arith.constant 0.000000e+00 : f32
    %1 = vector.broadcast %cst : f32 to vector<1x2048xf32>
    %2 = arith.maximumf %0, %1 : vector<1x2048xf32>
    %cst_1 = arith.constant 2.550000e+02 : f32
    %3 = vector.broadcast %cst_1 : f32 to vector<1x2048xf32>
    %4 = arith.minimumf %2, %3 : vector<1x2048xf32>
    %c0_2 = arith.constant 0 : index
    %c0_3 = arith.constant 0 : index
    %5 = vector.load %arg2[%c0_2, %c0_3] : memref<1x2048xf32, #tpu.memory_space<vmem>>, vector<1x2048xf32>
    tpu.vector_store %arg2[%c0_2, %c0_3], %4 {strides = array<i32>} : memref<1x2048xf32, #tpu.memory_space<vmem>>, vector<1x2048xf32>,
    return
  }
  func.func @transform_0(%arg0: i32) -> (i32, i32) {
    %c0_i32 = arith.constant 0 : i32
    %c0_i32_0 = arith.constant 0 : i32
    return %arg0, %c0_i32 : i32, i32
  }
  func.func @transform_1(%arg0: i32) -> (i32, i32) {
    %c0_i32 = arith.constant 0 : i32
    %c0_i32_0 = arith.constant 0 : i32
    return %arg0, %c0_i32 : i32, i32
  }
}

</mosaic_0001>

<bundles_post_ra>
// kernel: tpu_custom_call.1
= control target key start
LH: loop header
LB: loop body
LE: loop exit
PB: predicated region body
PF: predicated region fallthrough
CT: control target
= control target key end

     0   :  { %6 = vsyncpa [#allocation3], 0  ;;  %s120_s0 = inlined_call_operand.hbm [shape: f32[1,2048], index: 0, kind: input, shape index: {}]   ;;  %s121_s1 = inlined_call_operand.hbm [shape: f32[1,2048], index: 1, kind: output, shape index: {}]  }
   0x1   :  { %7 = vsyncpa [#allocation4], 0  ;;  %s13_s8 = sshll.u32 %s120_s0, 4  ;;  %s102_s9 = smov [#allocation2]   ;;  %s14_s8 = int_to_ptr.hbm [resolvable:$true] %s13_s8 }
   0x2   :  { %s15_s10 = sshll.u32 %s102_s9, 4  ;;  %s16_s10 = int_to_ptr.vmem [resolvable:$true] %s15_s10 }
   0x3   :  { %18 = dma.hbm_to_vmem [thread:$0]  %s14_s8, 256, %s16_s10, [#allocation3]  }
   0x4   :  { %98 = dma.done.wait [#allocation3], 256  }
   0x5   :  { %99 = vsyncadd [#allocation3], 4294967040  ;;  %v23_v0 = vld [vmem:[#allocation2] sm:$0xff]  ;;  %v24_v1 = vld [vmem:[#allocation2 + $0x8] sm:$0xff]  ;;  %s103_s11 = smov [#allocation5]   ;;  %s38_s15 = sshll.u32 %s121_s1, 4  ;;  %s39_s15 = int_to_ptr.hbm [resolvable:$true] %s38_s15 }
   0x6   :  { %v25_v2 = vmax.f32 %v23_v0, 0.0  ;;  %v26_v3 = vmax.f32 %v24_v1, 0.0  ;;  %s36_s12 = sshll.u32 %s103_s11, 4  ;;  %s37_s12 = int_to_ptr.vmem [resolvable:$true] %s36_s12 }
   0x8   :  { %v27_v4 = vmin.f32 %v25_v2, 255.0  ;;  %v28_v5 = vmin.f32 %v26_v3, 255.0 }
   0xa   :  { %29 = vst [vmem:[#allocation5] sm:$0xff] %v27_v4 }
   0xb   :  { %30 = vst [vmem:[#allocation5 + $0x8] sm:$0xff] %v28_v5 }
   0xc   :  { %41 = dma.vmem_to_hbm [thread:$0]  %s37_s12, 256, %s39_s15, [#allocation4]  }
   0xd   :  { %100 = dma.done.wait [#allocation4], 256  }
   0xe   :  { %101 = vsyncadd [#allocation4], 4294967040 }
   0xf   :  { %46 = vsyncpa [#allocation3], 1 }
  0x10   :  { %47 = vsyncpa [#allocation4], 1 }

</bundles_post_ra>
